<compile_context>
chip_gen: v7x
topology: tpu7x:2x2x1
jax: 0.10.0
libtpu: 0.0.40
codegen_flags: <defaults>
</compile_context>

<pallas_src>
import functools

import jax
import jax.numpy as jnp
from jax.experimental import pallas as pl
from jax.experimental.pallas import tpu as pltpu


def _round_up(n, m):
    return (n + m - 1) // m * m


# ----------------------------------------------------------------------------
# Kernel
# ----------------------------------------------------------------------------
def fusion_kernel(x_ref, fpm_ref, imm_ref, slab_ref,
                  out_fp_ref, out_img_ref, out_cross_ref,
                  *, row_b1, row_w2, row_b2):
    """One batch tile of the fused forward pass.

    x_ref:    (TB, F+I)  concat(fingerprint, image), f32 or bf16
    fpm_ref:  (1, F)     batch mean of fingerprint (f32, full batch)
    imm_ref:  (1, I)     batch mean of image       (f32, full batch)
    slab_ref: (R, W)     packed parameter slab (see pack_params)
    outputs:  (TB, F), (TB, I), (TB, F) -- all lane-0 aligned, f32
    """
    FI = x_ref.shape[1]          # F + I
    F = out_fp_ref.shape[1]
    W = slab_ref.shape[1]        # slab lane width (>= 3H, >= F+2)

    x = x_ref[...]

    # Static, sublane-aligned slices of the packed parameter slab (no copies).
    W1 = slab_ref[0:FI, :]                                   # (F+I, W)
    b1 = slab_ref[row_b1:row_b1 + 1, :].astype(jnp.float32)  # (1, W)
    W2 = slab_ref[row_w2:row_w2 + W, :]                      # (W, W)
    b2 = slab_ref[row_b2:row_b2 + 1, :].astype(jnp.float32)  # (1, W)

    # Fused first layer: one MXU call for all three attention branches.
    h = jnp.tanh(jnp.dot(x, W1, preferred_element_type=jnp.float32) + b1)   # (TB, W) f32

    # Fused second layer: cross (cols 0:F), s_fp (col F), s_img (col F+1).
    out2 = jnp.dot(h.astype(W2.dtype), W2,
                   preferred_element_type=jnp.float32) + b2                 # (TB, W) f32

    cross = out2[:, 0:F]                 # (TB, F), lane-0 aligned
    s_fp = out2[:, F:F + 1]              # (TB, 1)
    s_img = out2[:, F + 1:F + 2]         # (TB, 1)

    # 2-way softmax over modality scores (max-stabilized).
    m = jnp.maximum(s_fp, s_img)
    e_fp = jnp.exp(s_fp - m)
    e_img = jnp.exp(s_img - m)
    denom = e_fp + e_img
    inv = pl.reciprocal(denom, approx=True)      # EUP vrcp (free slot)
    inv = inv * (2.0 - denom * inv)              # one Newton step -> f32 accuracy
    w_fp = e_fp * inv                            # (TB, 1)
    w_img = e_img * inv                          # (TB, 1)

    # PyTorch broadcast (B,1,1)*(B,F)->(B,B,F) then mean(dim=1):
    #   result[i] = w[i] * mean_over_batch(x)   (mean hoisted to wrapper)
    out_fp_ref[...] = w_fp * fpm_ref[...]
    out_img_ref[...] = w_img * imm_ref[...]
    out_cross_ref[...] = cross


# ----------------------------------------------------------------------------
# Parameter construction / packing
# ----------------------------------------------------------------------------
def init_params(fingerprint_dim, image_dim, hidden_dim, key):
    """Deterministic synthetic parameters, shapes matching the PyTorch module
    (stored in x @ W convention)."""
    ks = jax.random.split(key, 12)

    def lin(kw, kb, d_in, d_out):
        bound = 1.0 / jnp.sqrt(d_in)
        w = jax.random.uniform(kw, (d_in, d_out), jnp.float32, -bound, bound)
        b = jax.random.uniform(kb, (1, d_out), jnp.float32, -bound, bound)
        return w, b

    F, I, H = fingerprint_dim, image_dim, hidden_dim
    wfa1, bfa1 = lin(ks[0], ks[1], F, H)
    wfa2, bfa2 = lin(ks[2], ks[3], H, 1)
    wia1, bia1 = lin(ks[4], ks[5], I, H)
    wia2, bia2 = lin(ks[6], ks[7], H, 1)
    wc1, bc1 = lin(ks[8], ks[9], F + I, H)
    wc2, bc2 = lin(ks[10], ks[11], H, F)
    return dict(wfa1=wfa1, bfa1=bfa1, wfa2=wfa2, bfa2=bfa2,
                wia1=wia1, bia1=bia1, wia2=wia2, bia2=bia2,
                wc1=wc1, bc1=bc1, wc2=wc2, bc2=bc2)


def pack_params(p, fingerprint_dim, image_dim, hidden_dim, dtype=jnp.float32):
    """Pack all weights/biases into one 2D slab (single DMA into VMEM).

    Row layout (row offsets aligned to 16 sublanes, safe for f32 and bf16):
      [0        : F+I)       fused first-layer weight  (F+I, W)
      [row_b1]               fused first-layer bias    (1, W)
      [row_w2   : row_w2+W)  fused second-layer weight (W, W)
      [row_b2]               fused second-layer bias   (1, W)
    Column layout of the fused activations / second layer output:
      first layer : [0:H]=fp-attn hidden, [H:2H]=img-attn hidden, [2H:3H]=cross hidden
      second layer: [0:F]=cross, [F]=s_fp, [F+1]=s_img
    """
    F, I, H = fingerprint_dim, image_dim, hidden_dim
    FI = F + I
    W = max(3 * H, FI, F + 2)            # slab lane width

    W1 = jnp.zeros((FI, W), jnp.float32)
    W1 = W1.at[:F, 0:H].set(p["wfa1"])
    W1 = W1.at[F:, H:2 * H].set(p["wia1"])
    W1 = W1.at[:, 2 * H:3 * H].set(p["wc1"])
    b1 = jnp.zeros((1, W), jnp.float32)
    b1 = b1.at[:, 0:H].set(p["bfa1"])
    b1 = b1.at[:, H:2 * H].set(p["bia1"])
    b1 = b1.at[:, 2 * H:3 * H].set(p["bc1"])

    W2 = jnp.zeros((W, W), jnp.float32)
    W2 = W2.at[2 * H:3 * H, 0:F].set(p["wc2"])
    W2 = W2.at[0:H, F].set(p["wfa2"][:, 0])
    W2 = W2.at[H:2 * H, F + 1].set(p["wia2"][:, 0])
    b2 = jnp.zeros((1, W), jnp.float32)
    b2 = b2.at[:, 0:F].set(p["bc2"])
    b2 = b2.at[0, F].set(p["bfa2"][0, 0])
    b2 = b2.at[0, F + 1].set(p["bia2"][0, 0])

    ALIGN = 16
    row_b1 = _round_up(FI, ALIGN)
    row_w2 = _round_up(row_b1 + 1, ALIGN)
    row_b2 = _round_up(row_w2 + W, ALIGN)
    n_rows = _round_up(row_b2 + 1, ALIGN)

    slab = jnp.zeros((n_rows, W), jnp.float32)
    slab = slab.at[0:FI, :].set(W1)
    slab = slab.at[row_b1:row_b1 + 1, :].set(b1)
    slab = slab.at[row_w2:row_w2 + W, :].set(W2)
    slab = slab.at[row_b2:row_b2 + 1, :].set(b2)

    return dict(slab=slab.astype(dtype), row_b1=row_b1, row_w2=row_w2,
                row_b2=row_b2)


# ----------------------------------------------------------------------------
# Wrapper
# ----------------------------------------------------------------------------
def multimodal_attention_fusion(fingerprint, image, packed, *, batch_tile=None):
    B, F = fingerprint.shape
    _, I = image.shape
    slab = packed["slab"]
    compute_dtype = slab.dtype

    # Concatenate modalities once; cast inputs to the compute dtype
    # (bf16 halves HBM->VMEM bytes on v6e/v7x; MXU accumulates in f32).
    x = jnp.concatenate([fingerprint, image], axis=1).astype(compute_dtype)  # (B, F+I)

    # Full-batch means hoisted out of the kernel (must NOT be computed per
    # batch tile -- see correctness note); kept in f32.
    fp_mean = jnp.mean(fingerprint, axis=0, keepdims=True)   # (1, F)
    img_mean = jnp.mean(image, axis=0, keepdims=True)        # (1, I)

    # Batch tiling: whole batch in one tile at these sizes; for production
    # pick batch_tile as a multiple of 8 (e.g. 256-1024) that divides B.
    tb = B if batch_tile is None else min(batch_tile, B)
    grid = (pl.cdiv(B, tb),)

    kernel = functools.partial(fusion_kernel,
                               row_b1=packed["row_b1"],
                               row_w2=packed["row_w2"],
                               row_b2=packed["row_b2"])

    out_fp, out_img, out_cross = pl.pallas_call(
        kernel,
        out_shape=(
            jax.ShapeDtypeStruct((B, F), jnp.float32),
            jax.ShapeDtypeStruct((B, I), jnp.float32),
            jax.ShapeDtypeStruct((B, F), jnp.float32),
        ),
        grid=grid,
        in_specs=[
            pl.BlockSpec((tb, F + I), lambda i: (i, 0)),    # batch-tiled input
            pl.BlockSpec((1, F), lambda i: (0, 0)),         # fp batch mean (resident)
            pl.BlockSpec((1, I), lambda i: (0, 0)),         # img batch mean (resident)
            pl.BlockSpec(slab.shape, lambda i: (0, 0)),     # packed params (resident)
        ],
        out_specs=(
            pl.BlockSpec((tb, F), lambda i: (i, 0)),
            pl.BlockSpec((tb, I), lambda i: (i, 0)),
            pl.BlockSpec((tb, F), lambda i: (i, 0)),
        ),
        compiler_params=pltpu.CompilerParams(
            dimension_semantics=("parallel",)),
    )(x, fp_mean, img_mean, slab)

    # Lane-0-aligned kernel outputs; final concat is a cheap XLA op.
    return jnp.concatenate([out_fp, out_img, out_cross], axis=1)


# ----------------------------------------------------------------------------
# Pure-JAX reference (exact PyTorch semantics, incl. the (B,B,F) broadcast)
# ----------------------------------------------------------------------------
def reference_forward(fingerprint, image, p):
    s_fp = jnp.tanh(fingerprint @ p["wfa1"] + p["bfa1"]) @ p["wfa2"] + p["bfa2"]  # (B,1)
    s_img = jnp.tanh(image @ p["wia1"] + p["bia1"]) @ p["wia2"] + p["bia2"]       # (B,1)
    combined = jnp.concatenate([fingerprint, image], axis=1)
    cross = jnp.tanh(combined @ p["wc1"] + p["bc1"]) @ p["wc2"] + p["bc2"]        # (B,F)
    attn = jax.nn.softmax(jnp.concatenate([s_fp, s_img], axis=1), axis=1)         # (B,2)
    fp_w = (attn[:, 0:1, None] * fingerprint[None, :, :]).mean(axis=1)
    img_w = (attn[:, 1:2, None] * image[None, :, :]).mean(axis=1)
    return jnp.concatenate([fp_w, img_w, cross], axis=1)


if __name__ == "__main__":
    B, F, I, H = 4, 16, 24, 32

    key = jax.random.PRNGKey(0)
    k_fp, k_img = jax.random.split(key)
    fingerprint = jax.random.normal(k_fp, (B, F), jnp.float32)
    image = jax.random.normal(k_img, (B, I), jnp.float32)

    params = init_params(F, I, H, jax.random.PRNGKey(42))
    ref = reference_forward(fingerprint, image, params)

    # f32 path (v5e-safe; elementwise math is f32 everywhere).
    packed_f32 = pack_params(params, F, I, H, dtype=jnp.float32)
    out = jax.block_until_ready(
        multimodal_attention_fusion(fingerprint, image, packed_f32))
    assert out.shape == (B, 2 * F + I)
    assert jnp.allclose(out, ref, atol=1e-4, rtol=1e-4)

    # bf16 input/weight path (v6e/v7x HBM-bandwidth optimization); f32 MXU
    # accumulation + f32 elementwise, so only a bf16-level tolerance applies.
    packed_bf16 = pack_params(params, F, I, H, dtype=jnp.bfloat16)
    out_bf16 = jax.block_until_ready(
        multimodal_attention_fusion(fingerprint, image, packed_bf16))
    assert out_bf16.shape == (B, 2 * F + I)
    assert jnp.allclose(out_bf16, ref, atol=1e-1, rtol=1e-1)

    print("KERNEL_OK")
</pallas_src>

<mosaic_0001>
module attributes {stable_mosaic.version = 11 : i64} {
  func.func @fusion_kernel(%arg0: i32, %arg1: memref<4x40xf32, #tpu.memory_space<vmem>>, %arg2: memref<1x16xf32, #tpu.memory_space<vmem>>, %arg3: memref<1x24xf32, #tpu.memory_space<vmem>>, %arg4: memref<176x96xf32, #tpu.memory_space<vmem>>, %arg5: memref<4x16xf32, #tpu.memory_space<vmem>>, %arg6: memref<4x24xf32, #tpu.memory_space<vmem>>, %arg7: memref<4x16xf32, #tpu.memory_space<vmem>>) attributes {dimension_semantics = [#tpu.dimension_semantics<parallel>], iteration_bounds = array<i64: 1>, scalar_prefetch = 0 : i64, scratch_operands = 0 : i64, tpu.core_type = #tpu.core_type<tc>, window_params = [{transform_indices = @transform_0, window_bounds = array<i64: 4, 40>}, {pipeline_mode = #tpu.pipeline_mode<synchronous>, transform_indices = @transform_1, window_bounds = array<i64: 1, 16>}, {pipeline_mode = #tpu.pipeline_mode<synchronous>, transform_indices = @transform_2, window_bounds = array<i64: 1, 24>}, {pipeline_mode = #tpu.pipeline_mode<synchronous>, transform_indices = @transform_3, window_bounds = array<i64: 176, 96>}, {transform_indices = @transform_4, window_bounds = array<i64: 4, 16>}, {transform_indices = @transform_5, window_bounds = array<i64: 4, 24>}, {transform_indices = @transform_6, window_bounds = array<i64: 4, 16>}]} {
    %c0 = arith.constant 0 : index
    %c0_0 = arith.constant 0 : index
    %0 = vector.load %arg1[%c0, %c0_0] : memref<4x40xf32, #tpu.memory_space<vmem>>, vector<4x40xf32>
    %c0_1 = arith.constant 0 : index
    %c0_2 = arith.constant 0 : index
    %1 = vector.load %arg4[%c0_1, %c0_2] : memref<176x96xf32, #tpu.memory_space<vmem>>, vector<40x96xf32>
    %c48 = arith.constant 48 : index
    %c0_3 = arith.constant 0 : index
    %2 = vector.load %arg4[%c48, %c0_3] : memref<176x96xf32, #tpu.memory_space<vmem>>, vector<1x96xf32>
    %c64 = arith.constant 64 : index
    %c0_4 = arith.constant 0 : index
    %3 = vector.load %arg4[%c64, %c0_4] : memref<176x96xf32, #tpu.memory_space<vmem>>, vector<96x96xf32>
    %c160 = arith.constant 160 : index
    %c0_5 = arith.constant 0 : index
    %4 = vector.load %arg4[%c160, %c0_5] : memref<176x96xf32, #tpu.memory_space<vmem>>, vector<1x96xf32>
    %cst = arith.constant dense<0.000000e+00> : vector<4x96xf32>
    %5 = tpu.matmul %0, %1, %cst {dimension_numbers = #tpu.dot_dimension_numbers<[1], [0], [0], [1], [0, 0, 1, 1], [], []>} : vector<4x40xf32>, vector<40x96xf32>, vector<4x96xf32> -> vector<4x96xf32>
    %6 = vector.broadcast %2 : vector<1x96xf32> to vector<4x96xf32>
    %7 = arith.addf %5, %6 : vector<4x96xf32>
    %8 = math.tanh %7 : vector<4x96xf32>
    %cst_6 = arith.constant dense<0.000000e+00> : vector<4x96xf32>
    %9 = tpu.matmul %8, %3, %cst_6 {dimension_numbers = #tpu.dot_dimension_numbers<[1], [0], [0], [1], [0, 0, 1, 1], [], []>} : vector<4x96xf32>, vector<96x96xf32>, vector<4x96xf32> -> vector<4x96xf32>
    %10 = vector.broadcast %4 : vector<1x96xf32> to vector<4x96xf32>
    %11 = arith.addf %9, %10 : vector<4x96xf32>
    %12 = vector.extract_strided_slice %11 {offsets = [0, 0], sizes = [4, 16], strides = [1, 1]} : vector<4x96xf32> to vector<4x16xf32>
    %13 = vector.extract_strided_slice %11 {offsets = [0, 16], sizes = [4, 1], strides = [1, 1]} : vector<4x96xf32> to vector<4x1xf32>
    %14 = vector.extract_strided_slice %11 {offsets = [0, 17], sizes = [4, 1], strides = [1, 1]} : vector<4x96xf32> to vector<4x1xf32>
    %15 = arith.maximumf %13, %14 : vector<4x1xf32>
    %16 = arith.subf %13, %15 : vector<4x1xf32>
    %17 = math.exp %16 : vector<4x1xf32>
    %18 = arith.subf %14, %15 : vector<4x1xf32>
    %19 = math.exp %18 : vector<4x1xf32>
    %20 = arith.addf %17, %19 : vector<4x1xf32>
    %21 = tpu.reciprocal %20 {approx = true} : vector<4x1xf32> -> vector<4x1xf32>
    %22 = arith.mulf %20, %21 : vector<4x1xf32>
    %cst_7 = arith.constant 2.000000e+00 : f32
    %23 = vector.broadcast %cst_7 : f32 to vector<4x1xf32>
    %24 = arith.subf %23, %22 : vector<4x1xf32>
    %25 = arith.mulf %21, %24 : vector<4x1xf32>
    %26 = arith.mulf %17, %25 : vector<4x1xf32>
    %27 = arith.mulf %19, %25 : vector<4x1xf32>
    %c0_8 = arith.constant 0 : index
    %c0_9 = arith.constant 0 : index
    %28 = vector.load %arg2[%c0_8, %c0_9] : memref<1x16xf32, #tpu.memory_space<vmem>>, vector<1x16xf32>
    %29 = vector.broadcast %26 : vector<4x1xf32> to vector<4x16xf32>
    %30 = vector.broadcast %28 : vector<1x16xf32> to vector<4x16xf32>
    %31 = arith.mulf %29, %30 : vector<4x16xf32>
    %c0_10 = arith.constant 0 : index
    %c0_11 = arith.constant 0 : index
    %32 = vector.load %arg5[%c0_10, %c0_11] : memref<4x16xf32, #tpu.memory_space<vmem>>, vector<4x16xf32>
    tpu.vector_store %arg5[%c0_10, %c0_11], %31 {strides = array<i32>} : memref<4x16xf32, #tpu.memory_space<vmem>>, vector<4x16xf32>,
    %c0_12 = arith.constant 0 : index
    %c0_13 = arith.constant 0 : index
    %33 = vector.load %arg3[%c0_12, %c0_13] : memref<1x24xf32, #tpu.memory_space<vmem>>, vector<1x24xf32>
    %34 = vector.broadcast %27 : vector<4x1xf32> to vector<4x24xf32>
    %35 = vector.broadcast %33 : vector<1x24xf32> to vector<4x24xf32>
    %36 = arith.mulf %34, %35 : vector<4x24xf32>
    %c0_14 = arith.constant 0 : index
    %c0_15 = arith.constant 0 : index
    %37 = vector.load %arg6[%c0_14, %c0_15] : memref<4x24xf32, #tpu.memory_space<vmem>>, vector<4x24xf32>
    tpu.vector_store %arg6[%c0_14, %c0_15], %36 {strides = array<i32>} : memref<4x24xf32, #tpu.memory_space<vmem>>, vector<4x24xf32>,
    %c0_16 = arith.constant 0 : index
    %c0_17 = arith.constant 0 : index
    %38 = vector.load %arg7[%c0_16, %c0_17] : memref<4x16xf32, #tpu.memory_space<vmem>>, vector<4x16xf32>
    tpu.vector_store %arg7[%c0_16, %c0_17], %12 {strides = array<i32>} : memref<4x16xf32, #tpu.memory_space<vmem>>, vector<4x16xf32>,
    return
  }
  func.func @transform_0(%arg0: i32) -> (i32, i32) {
    %c0_i32 = arith.constant 0 : i32
    %c0_i32_0 = arith.constant 0 : i32
    return %arg0, %c0_i32 : i32, i32
  }
  func.func @transform_1(%arg0: i32) -> (i32, i32) {
    %c0_i32 = arith.constant 0 : i32
    %c0_i32_0 = arith.constant 0 : i32
    %c0_i32_1 = arith.constant 0 : i32
    return %c0_i32, %c0_i32_0 : i32, i32
  }
  func.func @transform_2(%arg0: i32) -> (i32, i32) {
    %c0_i32 = arith.constant 0 : i32
    %c0_i32_0 = arith.constant 0 : i32
    %c0_i32_1 = arith.constant 0 : i32
    return %c0_i32, %c0_i32_0 : i32, i32
  }
  func.func @transform_3(%arg0: i32) -> (i32, i32) {
    %c0_i32 = arith.constant 0 : i32
    %c0_i32_0 = arith.constant 0 : i32
    %c0_i32_1 = arith.constant 0 : i32
    return %c0_i32, %c0_i32_0 : i32, i32
  }
  func.func @transform_4(%arg0: i32) -> (i32, i32) {
    %c0_i32 = arith.constant 0 : i32
    %c0_i32_0 = arith.constant 0 : i32
    return %arg0, %c0_i32 : i32, i32
  }
  func.func @transform_5(%arg0: i32) -> (i32, i32) {
    %c0_i32 = arith.constant 0 : i32
    %c0_i32_0 = arith.constant 0 : i32
    return %arg0, %c0_i32 : i32, i32
  }
  func.func @transform_6(%arg0: i32) -> (i32, i32) {
    %c0_i32 = arith.constant 0 : i32
    %c0_i32_0 = arith.constant 0 : i32
    return %arg0, %c0_i32 : i32, i32
  }
}

</mosaic_0001>

<bundles_post_ra>
// kernel: tpu_custom_call.1
= control target key start
LH: loop header
LB: loop body
LE: loop exit
PB: predicated region body
PF: predicated region fallthrough
CT: control target
= control target key end

     0   :  { %12 = vsyncpa [#allocation3], 0  ;;  %s684_s0 = inlined_call_operand.hbm [shape: f32[4,40], index: 0, kind: input, shape index: {}]   ;;  %s685_s1 = inlined_call_operand.vmem [shape: f32[1,16], index: 1, kind: input, shape index: {}]   ;;  %s686_s2 = inlined_call_operand.vmem [shape: f32[1,24], index: 2, kind: input, shape index: {}]   ;;  %s687_s3 = inlined_call_operand.hbm [shape: f32[176,96], index: 3, kind: input, shape index: {}]   ;;  %s688_s4 = inlined_call_operand.hbm [shape: f32[4,16], index: 4, kind: output, shape index: {0}]   ;;  %s689_s5 = inlined_call_operand.hbm [shape: f32[4,24], index: 5, kind: output, shape index: {1}]   ;;  %s690_s6 = inlined_call_operand.hbm [shape: f32[4,16], index: 6, kind: output, shape index: {2}]  }
   0x1   :  { %13 = vsyncpa [#allocation6], 0 }
   0x2   :  { %14 = vsyncpa [#allocation4], 0 }
   0x3   :  { %15 = vsyncpa [#allocation9], 0  ;;  %s560_s21 = smov [#allocation2]   ;;  %s561_s23 = smov [#allocation5]  }
   0x4   :  { %s22_s22 = sshll.u32 %s560_s21, 4  ;;  %s35_s24 = sshll.u32 %s561_s23, 4  ;;  %s23_s22 = int_to_ptr.vmem [resolvable:$true] %s22_s22  ;;  %s609_s24 = int_to_ptr.vmem [resolvable:$true] %s35_s24 }
   0x5   :  { %s442_s27 = scalar_lea.hbm %s684_s0, 64 }
   0x6   :  { %p443_p0 = scmp.ne.s32.totalorder %s684_s0, %s442_s27  ;;  %p446_p1 = scmp.lt.u32.totalorder %s442_s27, %s684_s0 }
   0x8   :  { %p448_p2 = pnand %p446_p1, %p443_p0 }
   0xa   :  { %451 = shalt.err (!%p448_p2)
}
   0xb   :  { %s452_s8 = scalar_lea.vmem %s23_s22, 64  ;;  %p457_p4 = scmp.lt.s32.totalorder %s23_s22, %s23_s22 }
   0xc   :  { %p453_p3 = scmp.ne.s32.totalorder %s23_s22, %s452_s8  ;;  %p458_p5 = scmp.lt.s32.totalorder %s452_s8, %s452_s8 }
   0xe   :  { %p459_p6 = por %p458_p5, %p457_p4 }
  0x10   :  { %p460_p7 = pnand %p459_p6, %p453_p3 }
  0x12   :  { %463 = shalt.err (!%p460_p7)
}
  0x13   :  { %25 = dma.hbm_to_vmem [thread:$0]  %s684_s0, 64, %s23_s22, [#allocation3]  }
  0x14   :  { %s464_s13 = scalar_lea.hbm %s687_s3, 2816 }
  0x15   :  { %p465_p8 = scmp.ne.s32.totalorder %s687_s3, %s464_s13  ;;  %p468_p9 = scmp.lt.u32.totalorder %s464_s13, %s687_s3 }
  0x17   :  { %p470_p10 = pnand %p468_p9, %p465_p8 }
  0x19   :  { %473 = shalt.err (!%p470_p10)
}
  0x1a   :  { %s474_s18 = scalar_lea.vmem %s609_s24, 2816  ;;  %p479_p12 = scmp.lt.s32.totalorder %s609_s24, %s609_s24 }
  0x1b   :  { %p475_p11 = scmp.ne.s32.totalorder %s609_s24, %s474_s18  ;;  %p480_p13 = scmp.lt.s32.totalorder %s474_s18, %s474_s18 }
  0x1d   :  { %p481_p0 = por %p480_p13, %p479_p12 }
  0x1f   :  { %p482_p1 = pnand %p481_p0, %p475_p11 }
  0x21   :  { %485 = shalt.err (!%p482_p1)
}
  0x22   :  { %s562_s0 = smov 128   ;;  %s563_s19 = smov 8  }
  0x23   :  { %41 = dma.hbm_to_vmem [thread:$0]  %s687_s3, 2816, %s609_s24, [#allocation6], %s562_s0, %s562_s0, %s563_s19  }
  0x24   :  { %552 = dma.done.wait [#allocation3], 64  }
  0x25   :  { %553 = vsyncadd [#allocation3], 4294967232 }
  0x26   :  { %554 = dma.done.wait [#allocation6], 2816  }
  0x27   :  { %555 = vsyncadd [#allocation6], 4294964480  ;;  %v564_v0 = vmov 0.0|0.0   ;;  %vm565_vm0 = vmmov 0   ;;  %v566_v1 = vmov 0.0   ;;  %v49_v2 = vld [vmem:[#allocation5] sm:$0xff] }
  0x28   :  { %394 = vmatprep.subr.bf16.mxu0 %v564_v0  ;;  %364 = vmatprep.mubr.msk.f32.mxu0 %vm565_vm0, %v566_v1  ;;  %v50_v3 = vld [vmem:[#allocation5 + $0x8] sm:$0xff]  ;;  %v51_v4 = vld [vmem:[#allocation5 + $0x10] sm:$0xff]  ;;  %v52_v6 = vld [vmem:[#allocation5 + $0x18] sm:$0xff]  ;;  %vm72_vm1 = vcmask 326656   ;;  %vm151_vm2 = vcmask 785408   ;;  %vm268_vm3 = vcmask 125952  }
  0x29   :  { %400 = vmatprep.subr.bf16.mxu1 %v564_v0  ;;  %391 = vmatprep.mubr.msk.f32.mxu1 %vm565_vm0, %v566_v1  ;;  %v395_v5 = vpack.c.bf16 %v50_v3, %v49_v2  ;;  %v55_v7 = vld [vmem:[#allocation5 + $0x40] sm:$0xff]  ;;  %v56_v8 = vld [vmem:[#allocation5 + $0x48] sm:$0xff]  ;;  %v57_v9 = vld [vmem:[#allocation5 + $0x50] sm:$0xff]  ;;  %v398_v10 = vpack.c.bf16 %v52_v6, %v51_v4  ;;  %s567_s3 = smov 127   ;;  %s568_s22 = smov 1   ;;  %v569_v43 = vmov 16  }
  0x2a   :  { %v401_v11 = vpack.c.bf16 %v56_v8, %v55_v7  ;;  %v58_v12 = vld [vmem:[#allocation5 + $0x58] sm:$0xff]  ;;  %v59_v14 = vld [vmem:[#allocation5 + $0x60] sm:$0xff]  ;;  %v60_v15 = vld [vmem:[#allocation5 + $0x68] sm:$0xff]  ;;  %433 = vset.pattern.permute.xlu1 %v569_v43  ;;  %v570_v49 = vmov 17   ;;  %s571_s25 = smov [#allocation7]  }
  0x2b   :  { %396 = vmatpush3.bf16.msra.mxu0 %v395_v5  ;;  %v404_v13 = vpack.c.bf16 %v58_v12, %v57_v9  ;;  %v53_v16 = vld [vmem:[#allocation5 + $0x20] sm:$0xff]  ;;  %v48_v17 = vld [vmem:[#allocation2] sm:$0xf]  ;;  %v407_v18 = vpack.c.bf16 %v60_v15, %v59_v14  ;;  %v61_v19 = vld [vmem:[#allocation5 + $0x70] sm:$0xff]  ;;  %432 = vset.pattern.permute.xlu0 %v570_v49  ;;  %s292_s26 = sshll.u32 %s571_s25, 4  ;;  %s293_s26 = int_to_ptr.vmem [resolvable:$true] %s292_s26 }
  0x2c   :  { %397 = vmatprep.subr.bf16.mxu0 %v564_v0  ;;  %402 = vmatpush3.bf16.msra.mxu1 %v401_v11  ;;  %v62_v20 = vld [vmem:[#allocation5 + $0x78] sm:$0xff]  ;;  %v63_v22 = vld [vmem:[#allocation5 + $0x80] sm:$0xff]  ;;  %v64_v23 = vld [vmem:[#allocation5 + $0x88] sm:$0xff]  ;;  %s486_s27 = scalar_lea.vmem %s293_s26, 64  ;;  %p491_p3 = scmp.lt.s32.totalorder %s293_s26, %s293_s26 }
  0x2d   :  { %403 = vmatprep.subr.bf16.mxu1 %v564_v0  ;;  %v410_v21 = vpack.c.bf16 %v62_v20, %v61_v19  ;;  %v413_v24 = vpack.c.bf16 %v64_v23, %v63_v22  ;;  %v65_v25 = vld [vmem:[#allocation5 + $0x90] sm:$0xff]  ;;  %v66_v26 = vld [vmem:[#allocation5 + $0x98] sm:$0xff]  ;;  %v331_v33 = vld [vmem:[#allocation5 + $0xa0] ss:$0 sm:$0xff]  ;;  %p487_p2 = scmp.ne.s32.totalorder %s293_s26, %s486_s27  ;;  %p492_p4 = scmp.lt.s32.totalorder %s486_s27, %s486_s27 }
  0x2e   :  { %v416_v27 = vpack.c.bf16 %v66_v26, %v65_v25  ;;  %v329_v28 = vld [vmem:[#allocation5 + $0x30] ss:$0 sm:$0xff]  ;;  %v333_v57 = vld [vmem:[%s685_s1] ss:$0 sm:$0xff] }
  0x2f   :  { %399 = vmatpush3.bf16.msra.mxu0 %v398_v10  ;;  %p493_p5 = por %p492_p4, %p491_p3 }
  0x30   :  { %362 = vmatprep.subr.mxu0 %v566_v1  ;;  %405 = vmatpush3.bf16.msra.mxu1 %v404_v13 }
  0x31   :  { %406 = vmatprep.subr.bf16.mxu1 %v564_v0  ;;  %p494_p6 = pnand %p493_p5, %p487_p2 }
  0x33   :  { %363 = vmatpush3.msra.mxu0 %v53_v16 }
  0x34   :  { %365 = vmatmul.mubr.msk.f32.vlgmr.msra.gmra.mrb[0].mxu0 %vm72_vm1, %v48_v17  ;;  %408 = vmatpush3.bf16.msra.mxu1 %v407_v18 }
  0x35   :  { %409 = vmatprep.subr.bf16.mxu1 %v564_v0 }
  0x38   :  { %411 = vmatpush3.bf16.msra.mxu1 %v410_v21 }
  0x39   :  { %412 = vmatprep.subr.bf16.mxu1 %v564_v0 }
  0x3c   :  { %414 = vmatpush3.bf16.msra.mxu1 %v413_v24 }
  0x3d   :  { %415 = vmatprep.subr.bf16.mxu1 %v564_v0 }
  0x40   :  { %417 = vmatpush3.bf16.msra.mxu1 %v416_v27 }
 0x107   :  { %v142_v29 = vpop.f32.mrb[0].mxu0 }
 0x108   :  { %v143_v30 = vadd.f32 %v329_v28, %v142_v29  ;;  %v366_v31 = vpop.f32.mrb[1].mxu0 }
 0x10a   :  { %434 = vtanh.f32 %v143_v30 }
 0x114   :  { %v435_v32 = vpop.eup %434 }
 0x115   :  { %392 = vmatmul.mubr.msk.f32.vlgmr.msra.gmra.mrb[0].mxu1 %vm151_vm2, %v435_v32 }
 0x1e8   :  { %v221_v34 = vpop.f32.mrb[0].mxu1 }
 0x1e9   :  { %v222_v35 = vadd.f32 %v331_v33, %v221_v34  ;;  %v393_v36 = vpop.f32.mrb[1].mxu1 }
 0x1eb   :  { %226 = vrot.lane.b32.xlu0 %v222_v35, %s567_s3  ;;  %285 = vst.msk [vmem:[#allocation10] sm:$0xf] %vm268_vm3, %v222_v35 }
 0x25d   :  { %v227_v37 = vpop.permute.xlu0 %226 }
 0x25e   :  { %v229_v38 = vmax.f32 %v222_v35, %v227_v37 }
 0x260   :  { %234 = vrot.lane.b32.xlu0 %v229_v38, %s568_s22  ;;  %v230_v44 = vsub.f32 %v222_v35, %v229_v38 }
 0x262   :  { %v231_v45 = vmul.f32 1.442695, %v230_v44 }
 0x2d2   :  { %v235_v39 = vpop.permute.xlu0 %234 }
 0x2d3   :  { %v237_v40 = vsub.f32 %v222_v35, %v235_v39 }
 0x2d5   :  { %v238_v41 = vmul.f32 1.442695, %v237_v40 }
 0x2d7   :  { %436 = vpow2.f32 %v238_v41 }
 0x2d8   :  { %438 = vpow2.f32 %v231_v45 }
 0x2e1   :  { %v437_v42 = vpop.eup %436 }
 0x2e2   :  { %241 = vrot.lane.b32.xlu1 %v437_v42, %s567_s3  ;;  %v439_v46 = vpop.eup %438 }
 0x354   :  { %v242_v47 = vpop.permute.xlu1 %241 }
 0x355   :  { %v244_v48 = vadd.f32 %v439_v46, %v242_v47 }
 0x357   :  { %440 = vrcp.f32 %v244_v48 }
 0x361   :  { %v441_v50 = vpop.eup %440 }
 0x362   :  { %v246_v51 = vmul.f32 %v441_v50, %v244_v48 }
 0x364   :  { %v247_v52 = vsub.f32 2.0, %v246_v51 }
 0x366   :  { %v248_v53 = vmul.f32 %v441_v50, %v247_v52 }
 0x368   :  { %251 = vrot.lane.b32.xlu1 %v248_v53, %s568_s22  ;;  %v249_v54 = vmul.f32 %v439_v46, %v248_v53 }
 0x36c   :  { %258 = vperm.xlu1 %433, %v249_v54  }
 0x3da   :  { %v252_v55 = vpop.permute.xlu1 %251 }
 0x3db   :  { %v254_v56 = vmul.f32 %v437_v42, %v252_v55 }
 0x3dd   :  { %273 = vperm.xlu0 %432, %v254_v56  }
 0x3eb   :  { %v259_v58 = vpop.permute.xlu1 %258 }
 0x3ec   :  { %v267_v59 = vmul.f32 %v333_v57, %v259_v58 }
 0x3ee   :  { %269 = vst.msk [vmem:[#allocation7] sm:$0xf] %vm268_vm3, %v267_v59 }
 0x3ef   :  { %497 = shalt.err (!%p494_p6)
}
 0x3f0   :  { %s498_s30 = scalar_lea.hbm %s688_s4, 64 }
 0x3f1   :  { %p499_p7 = scmp.ne.s32.totalorder %s688_s4, %s498_s30  ;;  %p502_p8 = scmp.lt.u32.totalorder %s498_s30, %s688_s4 }
 0x3f3   :  { %p504_p9 = pnand %p502_p8, %p499_p7 }
 0x3f5   :  { %507 = shalt.err (!%p504_p9)
}
 0x3f6   :  { %295 = dma.vmem_to_hbm [thread:$0]  %s293_s26, 64, %s688_s4, [#allocation4]   ;;  %v334_v60 = vld [vmem:[%s686_s2] ss:$0 sm:$0xff]  ;;  %vm283_vm4 = vcmask 191488  }
 0x3f7   :  { %s572_s14 = smov [#allocation8]   ;;  %s573_s16 = smov [#allocation10]  }
 0x3f8   :  { %s302_s15 = sshll.u32 %s572_s14, 4  ;;  %s312_s17 = sshll.u32 %s573_s16, 4  ;;  %s303_s15 = int_to_ptr.vmem [resolvable:$true] %s302_s15  ;;  %s313_s17 = int_to_ptr.vmem [resolvable:$true] %s312_s17 }
 0x3f9   :  { %s508_s18 = scalar_lea.vmem %s303_s15, 64  ;;  %p513_p11 = scmp.lt.s32.totalorder %s303_s15, %s303_s15 }
 0x3fa   :  { %p509_p10 = scmp.ne.s32.totalorder %s303_s15, %s508_s18  ;;  %p514_p12 = scmp.lt.s32.totalorder %s508_s18, %s508_s18 }
 0x3fc   :  { %p515_p13 = por %p514_p12, %p513_p11 }
 0x3fe   :  { %p516_p0 = pnand %p515_p13, %p509_p10 }
 0x45c   :  { %v274_v61 = vpop.permute.xlu0 %273 }
 0x45d   :  { %v282_v62 = vmul.f32 %v334_v60, %v274_v61 }
 0x45f   :  { %284 = vst.msk [vmem:[#allocation8] sm:$0xf] %vm283_vm4, %v282_v62 }
 0x460   :  { %519 = shalt.err (!%p516_p0)
}
 0x461   :  { %s520_s2 = scalar_lea.hbm %s689_s5, 64 }
 0x462   :  { %p521_p1 = scmp.ne.s32.totalorder %s689_s5, %s520_s2  ;;  %p524_p2 = scmp.lt.u32.totalorder %s520_s2, %s689_s5 }
 0x464   :  { %p526_p3 = pnand %p524_p2, %p521_p1 }
 0x466   :  { %529 = shalt.err (!%p526_p3)
}
 0x467   :  { %305 = dma.vmem_to_hbm [thread:$0]  %s303_s15, 64, %s689_s5, [#allocation9]  }
 0x468   :  { %s530_s24 = scalar_lea.vmem %s313_s17, 64  ;;  %p535_p5 = scmp.lt.s32.totalorder %s313_s17, %s313_s17 }
 0x469   :  { %p531_p4 = scmp.ne.s32.totalorder %s313_s17, %s530_s24  ;;  %p536_p6 = scmp.lt.s32.totalorder %s530_s24, %s530_s24 }
 0x46b   :  { %p537_p7 = por %p536_p6, %p535_p5 }
 0x46d   :  { %p538_p8 = pnand %p537_p7, %p531_p4 }
 0x46f   :  { %541 = shalt.err (!%p538_p8)
}
 0x470   :  { %s542_s27 = scalar_lea.hbm %s690_s6, 64 }
 0x471   :  { %p543_p9 = scmp.ne.s32.totalorder %s690_s6, %s542_s27  ;;  %p546_p10 = scmp.lt.u32.totalorder %s542_s27, %s690_s6 }
 0x473   :  { %p548_p11 = pnand %p546_p10, %p543_p9 }
 0x475   :  { %551 = shalt.err (!%p548_p11)
}
 0x476   :  { %315 = dma.vmem_to_hbm [thread:$0]  %s313_s17, 64, %s690_s6, [#allocation9]  }
 0x477   :  { %556 = dma.done.wait [#allocation4], 64  }
 0x478   :  { %557 = vsyncadd [#allocation4], 4294967232 }
 0x479   :  { %558 = dma.done.wait [#allocation9], 128  }
 0x47a   :  { %559 = vsyncadd [#allocation9], 4294967168 }
 0x47b   :  { %325 = vsyncpa [#allocation3], 1 }
 0x47c   :  { %326 = vsyncpa [#allocation6], 1 }
 0x47d   :  { %327 = vsyncpa [#allocation4], 1 }
 0x47e   :  { %328 = vsyncpa [#allocation9], 1 }

</bundles_post_ra>
